<compile_context>
chip_gen: v7x
topology: tpu7x:2x2x1
jax: 0.10.0
libtpu: 0.0.40
codegen_flags: <defaults>
</compile_context>

<pallas_src>
import jax
import jax.numpy as jnp
from jax.experimental import pallas as pl
from jax.experimental.pallas import tpu as pltpu

LN_EPS = 1e-5  # PyTorch nn.LayerNorm default


def _layernorm(h, gamma, beta):
    mu = jnp.mean(h, axis=-1, keepdims=True)
    # E[x^2] - mu^2 saves one full (h - mu) pass; clamp for rounding safety.
    var = jnp.maximum(jnp.mean(h * h, axis=-1, keepdims=True) - mu * mu, 0.0)
    s = gamma * jax.lax.rsqrt(var + LN_EPS)   # rsqrt -> EUP slot (cheap)
    return (h - mu) * s + beta


def discriminator_kernel(x_ref,
                         w1_ref, b1_ref, g1_ref, be1_ref,
                         w2_ref, b2_ref, g2_ref, be2_ref,
                         w3t_ref, b3_ref,
                         out_ref):
    # Bind each resident operand exactly once per tile.
    x = x_ref[...]                       # (TB, 2) f32
    w1 = w1_ref[...]                     # (2, 64)
    b1 = b1_ref[...]                     # (1, 64)
    g1, be1 = g1_ref[...], be1_ref[...]  # (1, 64)
    w2 = w2_ref[...]                     # (64, 128) bf16 (pre-cast in wrapper)
    b2 = b2_ref[...]                     # (1, 128)
    g2, be2 = g2_ref[...], be2_ref[...]  # (1, 128)
    w3t = w3t_ref[...]                   # (2, 128)  (PyTorch [out, in] layout)
    b3 = b3_ref[...]                     # (1, 2)

    # ----- Linear(2, 64) on the VPU (K=2 would waste a full MXU pass) -----
    h = x[:, 0:1] * w1[0:1, :] + x[:, 1:2] * w1[1:2, :] + b1
    h = _layernorm(h, g1, be1)
    h = jnp.maximum(h, 0.0)
    # Dropout(p=0.3): identity in eval mode.
    # TODO(synk): train-mode dropout via pltpu.prng_seed/prng_random_bits mask.

    # ----- Linear(64, 128): the only MXU-worthy matmul (bf16 in, f32 acc) ----
    h = jnp.dot(h.astype(jnp.bfloat16), w2,
                preferred_element_type=jnp.float32) + b2
    h = _layernorm(h, g2, be2)
    h = jnp.maximum(h, 0.0)
    # Dropout(p=0.3): identity in eval mode.

    # ----- Linear(128, 2) as two lane reductions (N=2 would waste the MXU) ---
    o0 = jnp.sum(h * w3t[0:1, :], axis=-1, keepdims=True)
    o1 = jnp.sum(h * w3t[1:2, :], axis=-1, keepdims=True)
    out_ref[...] = (jnp.concatenate([o0, o1], axis=-1) + b3).astype(out_ref.dtype)


def discriminator_forward(x, params, *, block_b=4096):
    (w1, b1, g1, be1, w2, b2, g2, be2, w3t, b3) = params
    B = x.shape[0]
    # Tile size: full batch if small, else a multiple-of-8 tile sized for the
    # v7x 64 MiB VMEM budget (f32 intermediates + double buffering << 32 MiB).
    tb = B if B <= block_b else block_b
    grid = (pl.cdiv(B, tb),)

    def resident(shape):
        # Weight / bias / LN params: same block every step -> stay in VMEM.
        return pl.BlockSpec(shape, lambda i: (0, 0))

    w2_bf16 = w2.astype(jnp.bfloat16)   # pre-cast once; native MXU input dtype

    weight_bytes = 4 * (w1.size + b1.size + g1.size + be1.size + b2.size
                        + g2.size + be2.size + w3t.size + b3.size) + 2 * w2.size
    cost = pl.CostEstimate(
        flops=2 * B * (2 * 64 + 64 * 128 + 128 * 2),
        transcendentals=2 * B,                       # two rsqrt per row
        bytes_accessed=B * 2 * 4 * 2 + weight_bytes,
    )

    return pl.pallas_call(
        discriminator_kernel,
        out_shape=jax.ShapeDtypeStruct((B, 2), jnp.float32),
        grid=grid,
        in_specs=[
            pl.BlockSpec((tb, 2), lambda i: (i, 0)),      # x: batch-tiled
            resident((2, 64)), resident((1, 64)), resident((1, 64)), resident((1, 64)),
            resident((64, 128)), resident((1, 128)), resident((1, 128)), resident((1, 128)),
            resident((2, 128)), resident((1, 2)),
        ],
        out_specs=pl.BlockSpec((tb, 2), lambda i: (i, 0)),
        compiler_params=pltpu.CompilerParams(
            dimension_semantics=("parallel",)),           # megacore on v7x
        cost_estimate=cost,
    )(x, w1, b1, g1, be1, w2_bf16, b2, g2, be2, w3t, b3)


def init_params(key):
    """Deterministic init mimicking PyTorch Linear default (uniform +-1/sqrt(fan_in))."""
    def linear(key, fan_in, fan_out, transposed=False):
        k_w, k_b = jax.random.split(key)
        bound = 1.0 / jnp.sqrt(fan_in)
        shape = (fan_out, fan_in) if transposed else (fan_in, fan_out)
        w = jax.random.uniform(k_w, shape, jnp.float32, -bound, bound)
        b = jax.random.uniform(k_b, (1, fan_out), jnp.float32, -bound, bound)
        return w, b

    k1, k2, k3 = jax.random.split(key, 3)
    w1, b1 = linear(k1, 2, 64)                     # [in, out]
    w2, b2 = linear(k2, 64, 128)                   # [in, out]
    w3t, b3 = linear(k3, 128, 2, transposed=True)  # [out, in] (lane-dense rows)
    g1, be1 = jnp.ones((1, 64), jnp.float32), jnp.zeros((1, 64), jnp.float32)
    g2, be2 = jnp.ones((1, 128), jnp.float32), jnp.zeros((1, 128), jnp.float32)
    return (w1, b1, g1, be1, w2, b2, g2, be2, w3t, b3)


def reference_forward(x, params):
    """Pure-f32 reference with PyTorch semantics."""
    (w1, b1, g1, be1, w2, b2, g2, be2, w3t, b3) = params

    def ln(h, g, be):
        mu = h.mean(-1, keepdims=True)
        var = ((h - mu) ** 2).mean(-1, keepdims=True)
        return (h - mu) / jnp.sqrt(var + LN_EPS) * g + be

    h = jnp.maximum(ln(x @ w1 + b1, g1, be1), 0.0)
    h = jnp.maximum(ln(h @ w2 + b2, g2, be2), 0.0)
    return h @ w3t.T + b3


if __name__ == "__main__":
    key = jax.random.PRNGKey(0)
    k_params, k_x1, k_x2 = jax.random.split(key, 3)
    params = init_params(k_params)

    # Tolerance is set for the bf16-fed middle matmul (f32 accumulation).
    ATOL = RTOL = 5e-2

    # Small batch: single grid step (tile == full batch).
    B = 8
    x = jax.random.normal(k_x1, (B, 2), jnp.float32)
    out = jax.block_until_ready(discriminator_forward(x, params))
    ref = reference_forward(x, params)
    assert out.shape == (B, 2), out.shape
    assert jnp.allclose(out, ref, atol=ATOL, rtol=RTOL), (out, ref)

    # Multi-step grid with a partial last tile (exercises the batch pipeline).
    B2 = 300
    x2 = jax.random.normal(k_x2, (B2, 2), jnp.float32)
    out2 = jax.block_until_ready(discriminator_forward(x2, params, block_b=128))
    ref2 = reference_forward(x2, params)
    assert out2.shape == (B2, 2), out2.shape
    assert jnp.allclose(out2, ref2, atol=ATOL, rtol=RTOL)

    print("KERNEL_OK")
</pallas_src>

<mosaic_0001>
module attributes {stable_mosaic.version = 11 : i64} {
  func.func @discriminator_kernel(%arg0: i32, %arg1: memref<8x2xf32, #tpu.memory_space<vmem>>, %arg2: memref<2x64xf32, #tpu.memory_space<vmem>>, %arg3: memref<1x64xf32, #tpu.memory_space<vmem>>, %arg4: memref<1x64xf32, #tpu.memory_space<vmem>>, %arg5: memref<1x64xf32, #tpu.memory_space<vmem>>, %arg6: memref<64x128xbf16, #tpu.memory_space<vmem>>, %arg7: memref<1x128xf32, #tpu.memory_space<vmem>>, %arg8: memref<1x128xf32, #tpu.memory_space<vmem>>, %arg9: memref<1x128xf32, #tpu.memory_space<vmem>>, %arg10: memref<2x128xf32, #tpu.memory_space<vmem>>, %arg11: memref<1x2xf32, #tpu.memory_space<vmem>>, %arg12: memref<8x2xf32, #tpu.memory_space<vmem>>) attributes {dimension_semantics = [#tpu.dimension_semantics<parallel>], iteration_bounds = array<i64: 1>, scalar_prefetch = 0 : i64, scratch_operands = 0 : i64, tpu.core_type = #tpu.core_type<tc>, window_params = [{transform_indices = @transform_0, window_bounds = array<i64: 8, 2>}, {pipeline_mode = #tpu.pipeline_mode<synchronous>, transform_indices = @transform_1, window_bounds = array<i64: 2, 64>}, {pipeline_mode = #tpu.pipeline_mode<synchronous>, transform_indices = @transform_2, window_bounds = array<i64: 1, 64>}, {pipeline_mode = #tpu.pipeline_mode<synchronous>, transform_indices = @transform_3, window_bounds = array<i64: 1, 64>}, {pipeline_mode = #tpu.pipeline_mode<synchronous>, transform_indices = @transform_4, window_bounds = array<i64: 1, 64>}, {pipeline_mode = #tpu.pipeline_mode<synchronous>, transform_indices = @transform_5, window_bounds = array<i64: 64, 128>}, {pipeline_mode = #tpu.pipeline_mode<synchronous>, transform_indices = @transform_6, window_bounds = array<i64: 1, 128>}, {pipeline_mode = #tpu.pipeline_mode<synchronous>, transform_indices = @transform_7, window_bounds = array<i64: 1, 128>}, {pipeline_mode = #tpu.pipeline_mode<synchronous>, transform_indices = @transform_8, window_bounds = array<i64: 1, 128>}, {pipeline_mode = #tpu.pipeline_mode<synchronous>, transform_indices = @transform_9, window_bounds = array<i64: 2, 128>}, {pipeline_mode = #tpu.pipeline_mode<synchronous>, transform_indices = @transform_10, window_bounds = array<i64: 1, 2>}, {transform_indices = @transform_11, window_bounds = array<i64: 8, 2>}]} {
    %c0 = arith.constant 0 : index
    %c0_0 = arith.constant 0 : index
    %0 = vector.load %arg1[%c0, %c0_0] : memref<8x2xf32, #tpu.memory_space<vmem>>, vector<8x2xf32>
    %c0_1 = arith.constant 0 : index
    %c0_2 = arith.constant 0 : index
    %1 = vector.load %arg2[%c0_1, %c0_2] : memref<2x64xf32, #tpu.memory_space<vmem>>, vector<2x64xf32>
    %c0_3 = arith.constant 0 : index
    %c0_4 = arith.constant 0 : index
    %2 = vector.load %arg3[%c0_3, %c0_4] : memref<1x64xf32, #tpu.memory_space<vmem>>, vector<1x64xf32>
    %c0_5 = arith.constant 0 : index
    %c0_6 = arith.constant 0 : index
    %3 = vector.load %arg4[%c0_5, %c0_6] : memref<1x64xf32, #tpu.memory_space<vmem>>, vector<1x64xf32>
    %c0_7 = arith.constant 0 : index
    %c0_8 = arith.constant 0 : index
    %4 = vector.load %arg5[%c0_7, %c0_8] : memref<1x64xf32, #tpu.memory_space<vmem>>, vector<1x64xf32>
    %c0_9 = arith.constant 0 : index
    %c0_10 = arith.constant 0 : index
    %5 = vector.load %arg6[%c0_9, %c0_10] : memref<64x128xbf16, #tpu.memory_space<vmem>>, vector<64x128xbf16>
    %c0_11 = arith.constant 0 : index
    %c0_12 = arith.constant 0 : index
    %6 = vector.load %arg7[%c0_11, %c0_12] : memref<1x128xf32, #tpu.memory_space<vmem>>, vector<1x128xf32>
    %c0_13 = arith.constant 0 : index
    %c0_14 = arith.constant 0 : index
    %7 = vector.load %arg8[%c0_13, %c0_14] : memref<1x128xf32, #tpu.memory_space<vmem>>, vector<1x128xf32>
    %c0_15 = arith.constant 0 : index
    %c0_16 = arith.constant 0 : index
    %8 = vector.load %arg9[%c0_15, %c0_16] : memref<1x128xf32, #tpu.memory_space<vmem>>, vector<1x128xf32>
    %c0_17 = arith.constant 0 : index
    %c0_18 = arith.constant 0 : index
    %9 = vector.load %arg10[%c0_17, %c0_18] : memref<2x128xf32, #tpu.memory_space<vmem>>, vector<2x128xf32>
    %c0_19 = arith.constant 0 : index
    %c0_20 = arith.constant 0 : index
    %10 = vector.load %arg11[%c0_19, %c0_20] : memref<1x2xf32, #tpu.memory_space<vmem>>, vector<1x2xf32>
    %11 = vector.extract_strided_slice %0 {offsets = [0, 0], sizes = [8, 1], strides = [1, 1]} : vector<8x2xf32> to vector<8x1xf32>
    %12 = vector.extract_strided_slice %1 {offsets = [0, 0], sizes = [1, 64], strides = [1, 1]} : vector<2x64xf32> to vector<1x64xf32>
    %13 = vector.broadcast %11 : vector<8x1xf32> to vector<8x64xf32>
    %14 = vector.broadcast %12 : vector<1x64xf32> to vector<8x64xf32>
    %15 = arith.mulf %13, %14 : vector<8x64xf32>
    %16 = vector.extract_strided_slice %0 {offsets = [0, 1], sizes = [8, 1], strides = [1, 1]} : vector<8x2xf32> to vector<8x1xf32>
    %17 = vector.extract_strided_slice %1 {offsets = [1, 0], sizes = [1, 64], strides = [1, 1]} : vector<2x64xf32> to vector<1x64xf32>
    %18 = vector.broadcast %16 : vector<8x1xf32> to vector<8x64xf32>
    %19 = vector.broadcast %17 : vector<1x64xf32> to vector<8x64xf32>
    %20 = arith.mulf %18, %19 : vector<8x64xf32>
    %21 = arith.addf %15, %20 : vector<8x64xf32>
    %22 = vector.broadcast %2 : vector<1x64xf32> to vector<8x64xf32>
    %23 = arith.addf %21, %22 : vector<8x64xf32>
    %cst = arith.constant dense<0.000000e+00> : vector<8xf32>
    %24 = vector.multi_reduction <add>, %23, %cst [1] : vector<8x64xf32> to vector<8xf32>
    %25 = vector.shape_cast %24 : vector<8xf32> to vector<8x1xf32>
    %cst_21 = arith.constant 6.400000e+01 : f32
    %26 = vector.broadcast %cst_21 : f32 to vector<8x1xf32>
    %27 = arith.divf %25, %26 : vector<8x1xf32>
    %28 = arith.mulf %23, %23 : vector<8x64xf32>
    %cst_22 = arith.constant dense<0.000000e+00> : vector<8xf32>
    %29 = vector.multi_reduction <add>, %28, %cst_22 [1] : vector<8x64xf32> to vector<8xf32>
    %30 = vector.shape_cast %29 : vector<8xf32> to vector<8x1xf32>
    %cst_23 = arith.constant 6.400000e+01 : f32
    %31 = vector.broadcast %cst_23 : f32 to vector<8x1xf32>
    %32 = arith.divf %30, %31 : vector<8x1xf32>
    %33 = arith.mulf %27, %27 : vector<8x1xf32>
    %34 = arith.subf %32, %33 : vector<8x1xf32>
    %cst_24 = arith.constant 0.000000e+00 : f32
    %35 = vector.broadcast %cst_24 : f32 to vector<8x1xf32>
    %36 = arith.maximumf %34, %35 : vector<8x1xf32>
    %cst_25 = arith.constant 9.99999974E-6 : f32
    %37 = vector.broadcast %cst_25 : f32 to vector<8x1xf32>
    %38 = arith.addf %36, %37 : vector<8x1xf32>
    %39 = math.rsqrt %38 : vector<8x1xf32>
    %40 = vector.broadcast %3 : vector<1x64xf32> to vector<8x64xf32>
    %41 = vector.broadcast %39 : vector<8x1xf32> to vector<8x64xf32>
    %42 = arith.mulf %40, %41 : vector<8x64xf32>
    %43 = vector.broadcast %27 : vector<8x1xf32> to vector<8x64xf32>
    %44 = arith.subf %23, %43 : vector<8x64xf32>
    %45 = arith.mulf %44, %42 : vector<8x64xf32>
    %46 = vector.broadcast %4 : vector<1x64xf32> to vector<8x64xf32>
    %47 = arith.addf %45, %46 : vector<8x64xf32>
    %cst_26 = arith.constant 0.000000e+00 : f32
    %48 = vector.broadcast %cst_26 : f32 to vector<8x64xf32>
    %49 = arith.maximumf %47, %48 : vector<8x64xf32>
    %50 = arith.truncf %49 : vector<8x64xf32> to vector<8x64xbf16>
    %cst_27 = arith.constant dense<0.000000e+00> : vector<8x128xf32>
    %51 = tpu.matmul %50, %5, %cst_27 {dimension_numbers = #tpu.dot_dimension_numbers<[1], [0], [0], [1], [0, 0, 1, 1], [], []>} : vector<8x64xbf16>, vector<64x128xbf16>, vector<8x128xf32> -> vector<8x128xf32>
    %52 = vector.broadcast %6 : vector<1x128xf32> to vector<8x128xf32>
    %53 = arith.addf %51, %52 : vector<8x128xf32>
    %cst_28 = arith.constant dense<0.000000e+00> : vector<8xf32>
    %54 = vector.multi_reduction <add>, %53, %cst_28 [1] : vector<8x128xf32> to vector<8xf32>
    %55 = vector.shape_cast %54 : vector<8xf32> to vector<8x1xf32>
    %cst_29 = arith.constant 1.280000e+02 : f32
    %56 = vector.broadcast %cst_29 : f32 to vector<8x1xf32>
    %57 = arith.divf %55, %56 : vector<8x1xf32>
    %58 = arith.mulf %53, %53 : vector<8x128xf32>
    %cst_30 = arith.constant dense<0.000000e+00> : vector<8xf32>
    %59 = vector.multi_reduction <add>, %58, %cst_30 [1] : vector<8x128xf32> to vector<8xf32>
    %60 = vector.shape_cast %59 : vector<8xf32> to vector<8x1xf32>
    %cst_31 = arith.constant 1.280000e+02 : f32
    %61 = vector.broadcast %cst_31 : f32 to vector<8x1xf32>
    %62 = arith.divf %60, %61 : vector<8x1xf32>
    %63 = arith.mulf %57, %57 : vector<8x1xf32>
    %64 = arith.subf %62, %63 : vector<8x1xf32>
    %cst_32 = arith.constant 0.000000e+00 : f32
    %65 = vector.broadcast %cst_32 : f32 to vector<8x1xf32>
    %66 = arith.maximumf %64, %65 : vector<8x1xf32>
    %cst_33 = arith.constant 9.99999974E-6 : f32
    %67 = vector.broadcast %cst_33 : f32 to vector<8x1xf32>
    %68 = arith.addf %66, %67 : vector<8x1xf32>
    %69 = math.rsqrt %68 : vector<8x1xf32>
    %70 = vector.broadcast %7 : vector<1x128xf32> to vector<8x128xf32>
    %71 = vector.broadcast %69 : vector<8x1xf32> to vector<8x128xf32>
    %72 = arith.mulf %70, %71 : vector<8x128xf32>
    %73 = vector.broadcast %57 : vector<8x1xf32> to vector<8x128xf32>
    %74 = arith.subf %53, %73 : vector<8x128xf32>
    %75 = arith.mulf %74, %72 : vector<8x128xf32>
    %76 = vector.broadcast %8 : vector<1x128xf32> to vector<8x128xf32>
    %77 = arith.addf %75, %76 : vector<8x128xf32>
    %cst_34 = arith.constant 0.000000e+00 : f32
    %78 = vector.broadcast %cst_34 : f32 to vector<8x128xf32>
    %79 = arith.maximumf %77, %78 : vector<8x128xf32>
    %80 = vector.extract_strided_slice %9 {offsets = [0, 0], sizes = [1, 128], strides = [1, 1]} : vector<2x128xf32> to vector<1x128xf32>
    %81 = vector.broadcast %80 : vector<1x128xf32> to vector<8x128xf32>
    %82 = arith.mulf %79, %81 : vector<8x128xf32>
    %cst_35 = arith.constant dense<0.000000e+00> : vector<8xf32>
    %83 = vector.multi_reduction <add>, %82, %cst_35 [1] : vector<8x128xf32> to vector<8xf32>
    %84 = vector.shape_cast %83 : vector<8xf32> to vector<8x1xf32>
    %85 = vector.extract_strided_slice %9 {offsets = [1, 0], sizes = [1, 128], strides = [1, 1]} : vector<2x128xf32> to vector<1x128xf32>
    %86 = vector.broadcast %85 : vector<1x128xf32> to vector<8x128xf32>
    %87 = arith.mulf %79, %86 : vector<8x128xf32>
    %cst_36 = arith.constant dense<0.000000e+00> : vector<8xf32>
    %88 = vector.multi_reduction <add>, %87, %cst_36 [1] : vector<8x128xf32> to vector<8xf32>
    %89 = vector.shape_cast %88 : vector<8xf32> to vector<8x1xf32>
    %90 = tpu.concatenate %84, %89 in 1 : vector<8x1xf32>, vector<8x1xf32> -> vector<8x2xf32>
    %91 = vector.broadcast %10 : vector<1x2xf32> to vector<8x2xf32>
    %92 = arith.addf %90, %91 : vector<8x2xf32>
    %c0_37 = arith.constant 0 : index
    %c0_38 = arith.constant 0 : index
    %93 = vector.load %arg12[%c0_37, %c0_38] : memref<8x2xf32, #tpu.memory_space<vmem>>, vector<8x2xf32>
    tpu.vector_store %arg12[%c0_37, %c0_38], %92 {strides = array<i32>} : memref<8x2xf32, #tpu.memory_space<vmem>>, vector<8x2xf32>,
    return
  }
  func.func @transform_0(%arg0: i32) -> (i32, i32) {
    %c0_i32 = arith.constant 0 : i32
    %c0_i32_0 = arith.constant 0 : i32
    return %arg0, %c0_i32 : i32, i32
  }
  func.func @transform_1(%arg0: i32) -> (i32, i32) {
    %c0_i32 = arith.constant 0 : i32
    %c0_i32_0 = arith.constant 0 : i32
    %c0_i32_1 = arith.constant 0 : i32
    return %c0_i32, %c0_i32_0 : i32, i32
  }
  func.func @transform_2(%arg0: i32) -> (i32, i32) {
    %c0_i32 = arith.constant 0 : i32
    %c0_i32_0 = arith.constant 0 : i32
    %c0_i32_1 = arith.constant 0 : i32
    return %c0_i32, %c0_i32_0 : i32, i32
  }
  func.func @transform_3(%arg0: i32) -> (i32, i32) {
    %c0_i32 = arith.constant 0 : i32
    %c0_i32_0 = arith.constant 0 : i32
    %c0_i32_1 = arith.constant 0 : i32
    return %c0_i32, %c0_i32_0 : i32, i32
  }
  func.func @transform_4(%arg0: i32) -> (i32, i32) {
    %c0_i32 = arith.constant 0 : i32
    %c0_i32_0 = arith.constant 0 : i32
    %c0_i32_1 = arith.constant 0 : i32
    return %c0_i32, %c0_i32_0 : i32, i32
  }
  func.func @transform_5(%arg0: i32) -> (i32, i32) {
    %c0_i32 = arith.constant 0 : i32
    %c0_i32_0 = arith.constant 0 : i32
    %c0_i32_1 = arith.constant 0 : i32
    return %c0_i32, %c0_i32_0 : i32, i32
  }
  func.func @transform_6(%arg0: i32) -> (i32, i32) {
    %c0_i32 = arith.constant 0 : i32
    %c0_i32_0 = arith.constant 0 : i32
    %c0_i32_1 = arith.constant 0 : i32
    return %c0_i32, %c0_i32_0 : i32, i32
  }
  func.func @transform_7(%arg0: i32) -> (i32, i32) {
    %c0_i32 = arith.constant 0 : i32
    %c0_i32_0 = arith.constant 0 : i32
    %c0_i32_1 = arith.constant 0 : i32
    return %c0_i32, %c0_i32_0 : i32, i32
  }
  func.func @transform_8(%arg0: i32) -> (i32, i32) {
    %c0_i32 = arith.constant 0 : i32
    %c0_i32_0 = arith.constant 0 : i32
    %c0_i32_1 = arith.constant 0 : i32
    return %c0_i32, %c0_i32_0 : i32, i32
  }
  func.func @transform_9(%arg0: i32) -> (i32, i32) {
    %c0_i32 = arith.constant 0 : i32
    %c0_i32_0 = arith.constant 0 : i32
    %c0_i32_1 = arith.constant 0 : i32
    return %c0_i32, %c0_i32_0 : i32, i32
  }
  func.func @transform_10(%arg0: i32) -> (i32, i32) {
    %c0_i32 = arith.constant 0 : i32
    %c0_i32_0 = arith.constant 0 : i32
    %c0_i32_1 = arith.constant 0 : i32
    return %c0_i32, %c0_i32_0 : i32, i32
  }
  func.func @transform_11(%arg0: i32) -> (i32, i32) {
    %c0_i32 = arith.constant 0 : i32
    %c0_i32_0 = arith.constant 0 : i32
    return %arg0, %c0_i32 : i32, i32
  }
}

</mosaic_0001>

<bundles_post_ra>
// kernel: tpu_custom_call.1
= control target key start
LH: loop header
LB: loop body
LE: loop exit
PB: predicated region body
PF: predicated region fallthrough
CT: control target
= control target key end

     0   :  { %16 = vsyncpa [#allocation3], 0  ;;  %s335_s17 = smov [#allocation2]   ;;  %s462_s0 = inlined_call_operand.vmem [shape: f32[8,2], index: 0, kind: input, shape index: {}]   ;;  %s463_s1 = inlined_call_operand.vmem [shape: f32[2,64], index: 1, kind: input, shape index: {}]   ;;  %s464_s2 = inlined_call_operand.vmem [shape: f32[1,64], index: 2, kind: input, shape index: {}]   ;;  %s465_s3 = inlined_call_operand.vmem [shape: f32[1,64], index: 3, kind: input, shape index: {}]   ;;  %s466_s4 = inlined_call_operand.vmem [shape: f32[1,64], index: 4, kind: input, shape index: {}]   ;;  %s467_s5 = inlined_call_operand.hbm [shape: bf16[64,128], index: 5, kind: input, shape index: {}]   ;;  %s468_s6 = inlined_call_operand.vmem [shape: f32[1,128], index: 6, kind: input, shape index: {}]   ;;  %s469_s7 = inlined_call_operand.vmem [shape: f32[1,128], index: 7, kind: input, shape index: {}]   ;;  %s470_s8 = inlined_call_operand.vmem [shape: f32[1,128], index: 8, kind: input, shape index: {}]   ;;  %s471_s9 = inlined_call_operand.vmem [shape: f32[2,128], index: 9, kind: input, shape index: {}]   ;;  %s472_s10 = inlined_call_operand.vmem [shape: f32[1,2], index: 10, kind: input, shape index: {}]   ;;  %s473_s11 = inlined_call_operand.vmem [shape: f32[8,2], index: 11, kind: output, shape index: {}]  }
   0x1   :  { %s32_s18 = sshll.u32 %s335_s17, 4  ;;  %s311_s21 = scalar_lea.hbm %s467_s5, 512  ;;  %s33_s18 = int_to_ptr.vmem [resolvable:$true] %s32_s18 }
   0x2   :  { %p312_p0 = scmp.ne.s32.totalorder %s467_s5, %s311_s21  ;;  %p315_p1 = scmp.lt.u32.totalorder %s311_s21, %s467_s5 }
   0x4   :  { %p317_p2 = pnand %p315_p1, %p312_p0 }
   0x6   :  { %320 = shalt.err (!%p317_p2)
}
   0x7   :  { %s321_s26 = scalar_lea.vmem %s33_s18, 512  ;;  %p326_p4 = scmp.lt.s32.totalorder %s33_s18, %s33_s18 }
   0x8   :  { %p322_p3 = scmp.ne.s32.totalorder %s33_s18, %s321_s26  ;;  %p327_p5 = scmp.lt.s32.totalorder %s321_s26, %s321_s26 }
   0xa   :  { %p328_p6 = por %p327_p5, %p326_p4 }
   0xc   :  { %p329_p7 = pnand %p328_p6, %p322_p3 }
   0xe   :  { %332 = shalt.err (!%p329_p7)
}
   0xf   :  { %s336_s27 = smov 64   ;;  %s337_s28 = smov 4  }
  0x10   :  { %38 = dma.hbm_to_vmem [thread:$0]  %s467_s5, 512, %s33_s18, [#allocation3], %s336_s27, %s336_s27, %s337_s28  }
  0x11   :  { %333 = dma.done.wait [#allocation3], 512  }
  0x12   :  { %334 = vsyncadd [#allocation3], 4294966784  ;;  %v338_v0 = vmov 0   ;;  %v53_v1 = vld [vmem:[%s462_s0] sm:$0xff]  ;;  %v339_v2 = vmov 1   ;;  %v76_v3 = vlaneseq  ;;  %vm98_vm0 = vcmask 523264  }
  0x13   :  { %301 = vset.pattern.permute.xlu0 %v338_v0  ;;  %v54_v7 = vld [vmem:[%s463_s1] sm:$0x3]  ;;  %v340_v21 = vmov 0.0   ;;  %vm341_vm1 = vmmov 0   ;;  %v304_v22 = vld [vmem:[#allocation2 + $0x8] sm:$0xff]   ;;  %v305_v23 = vld [vmem:[#allocation2 + $0x10] sm:$0xff]  }
  0x14   :  { %73 = vperm.xlu0 %301, %v53_v1   ;;  %v417_v4 = vshrl.u32 %v76_v3, 7  ;;  %v265_v14 = vld [vmem:[%s464_s2] ss:$0 sm:$0xff]  ;;  %282 = vmatprep.subr.bf16.mxu0 %v340_v21  ;;  %v306_v24 = vld [vmem:[#allocation2 + $0x18] sm:$0xff]   ;;  %vm249_vm2 = vcmask 7168   ;;  %vm258_vm3 = vcmask 15360  }
  0x15   :  { %v303_v20 = vld [vmem:[#allocation2] sm:$0xff]   ;;  %290 = vmatprep.mubr.msk.bf16.mxu0 %vm341_vm1, %v340_v21 }
  0x16   :  { %v78_v5 = vsub.s32 0, %v417_v4  ;;  %v87_v6 = vsub.s32 1, %v417_v4  ;;  %283 = vmatpush3.bf16.msra.mxu0 %v303_v20  ;;  %v266_v33 = vld [vmem:[%s465_s3] ss:$0 sm:$0xff] }
  0x17   :  { %284 = vmatprep.subr.bf16.mxu0 %v340_v21  ;;  %v267_v37 = vld [vmem:[%s466_s4] ss:$0 sm:$0xff] }
  0x18   :  { %302 = vset.pattern.permute.xlu0 %v339_v2  ;;  %v79_v9 = vrot.slane %v54_v7, %v78_v5  ;;  %v88_v10 = vrot.slane %v54_v7, %v87_v6  ;;  %v268_v42 = vld [vmem:[%s468_s6] ss:$0 sm:$0xff] }
  0x19   :  { %82 = vperm.xlu0 %302, %v53_v1   ;;  %v274_v57 = vld [vmem:[%s469_s7] ss:$0 sm:$0xff] }
  0x1a   :  { %285 = vmatpush3.bf16.msra.mxu0 %v304_v22  ;;  %v275_v61 = vld [vmem:[%s470_s8] ss:$0 sm:$0xff] }
  0x1b   :  { %286 = vmatprep.subr.bf16.mxu0 %v340_v21  ;;  %v69_v62 = vld [vmem:[%s471_s9] sm:$0x3] }
  0x1c   :  { %v238_v1 = vrot.slane %v69_v62, %v78_v5  ;;  %v245_v7 = vrot.slane %v69_v62, %v87_v6 }
  0x1e   :  { %287 = vmatpush3.bf16.msra.mxu0 %v305_v23 }
  0x1f   :  { %288 = vmatprep.subr.bf16.mxu0 %v340_v21 }
  0x22   :  { %289 = vmatpush3.bf16.msra.mxu0 %v306_v24 }
  0x93   :  { %v74_v8 = vpop.permute.xlu0 %73 }
  0x94   :  { %v80_v12 = vmul.f32 %v79_v9, %v74_v8 }
  0x98   :  { %v83_v11 = vpop.permute.xlu0 %82 }
  0x99   :  { %v89_v13 = vmul.f32 %v88_v10, %v83_v11  ;;  %v276_v10 = vld [vmem:[%s472_s10] ss:$0 sm:$0xff] }
  0x9b   :  { %v90_v15 = vadd.f32 %v89_v13, %v80_v12 }
  0x9d   :  { %v97_v16 = vadd.f32 %v265_v14, %v90_v15 }
  0x9f   :  { %v99_v17 = vsel %vm98_vm0, %v97_v16, 0.0  ;;  %v104_v18 = vmul.f32 %v97_v16, %v97_v16 }
  0xa0   :  { %100 = vadd.xlane.f32.xlu1 %v99_v17 }
  0xa1   :  { %v105_v19 = vsel %vm98_vm0, %v104_v18, 0.0 }
  0xa4   :  { %106 = vadd.xlane.f32.xlu1 %v105_v19 }
 0x12d   :  { %v101_v25 = vpop.xlane.xlu1 %100 }
 0x12e   :  { %v103_v26 = vmul.f32 0.015625, %v101_v25 }
 0x130   :  { %v109_v28 = vmul.f32 %v103_v26, %v103_v26  ;;  %v121_v35 = vsub.f32 %v97_v16, %v103_v26 }
 0x131   :  { %v107_v27 = vpop.xlane.xlu1 %106 }
 0x132   :  { %v108_v29 = vmul.f32 0.015625, %v107_v27 }
 0x134   :  { %v110_v30 = vsub.f32 %v108_v29, %v109_v28 }
 0x136   :  { %v111_v31 = vmax.f32 %v110_v30, 0.0 }
 0x138   :  { %v112_v32 = vadd.f32 1e-05, %v111_v31 }
 0x13a   :  { %307 = vrsqrt.f32 %v112_v32 }
 0x144   :  { %v308_v34 = vpop.eup %307 }
 0x145   :  { %v120_v36 = vmul.f32 %v308_v34, %v266_v33 }
 0x147   :  { %v122_v38 = vmul.f32 %v121_v35, %v120_v36 }
 0x149   :  { %v129_v39 = vadd.f32 %v267_v37, %v122_v38 }
 0x14b   :  { %v130_v40 = vmax.f32 %v129_v39, 0.0 }
 0x14d   :  { %v131_v41 = vpack.c.bf16 %v130_v40, %v130_v40 }
 0x14f   :  { %291 = vmatmul.mubr.msk.bf16.vlgmr.msra.gmra.mrb[0].mxu0 %vm98_vm0, %v131_v41 }
 0x222   :  { %v199_v43 = vpop.f32.mrb[0].mxu0 }
 0x223   :  { %v200_v44 = vadd.f32 %v268_v42, %v199_v43  ;;  %v292_v45 = vpop.f32.mrb[1].mxu0 }
 0x224   :  { %v202_v46 = vpop.f32.mrb[2].mxu0 }
 0x225   :  { %205 = vadd.xlane.f32.xlu1 %v200_v44  ;;  %v293_v47 = vpop.f32.mrb[3].mxu0  ;;  %v209_v48 = vmul.f32 %v200_v44, %v200_v44 }
 0x227   :  { %210 = vadd.xlane.f32.xlu0 %v209_v48 }
 0x2b2   :  { %v206_v49 = vpop.xlane.xlu1 %205 }
 0x2b3   :  { %v208_v50 = vmul.f32 0.0078125, %v206_v49 }
 0x2b4   :  { %v211_v51 = vpop.xlane.xlu0 %210 }
 0x2b5   :  { %v213_v52 = vmul.f32 %v208_v50, %v208_v50  ;;  %v212_v53 = vmul.f32 0.0078125, %v211_v51  ;;  %v225_v59 = vsub.f32 %v200_v44, %v208_v50 }
 0x2b7   :  { %v214_v54 = vsub.f32 %v212_v53, %v213_v52 }
 0x2b9   :  { %v215_v55 = vmax.f32 %v214_v54, 0.0 }
 0x2bb   :  { %v216_v56 = vadd.f32 1e-05, %v215_v55 }
 0x2bd   :  { %309 = vrsqrt.f32 %v216_v56 }
 0x2c7   :  { %v310_v58 = vpop.eup %309 }
 0x2c8   :  { %v224_v60 = vmul.f32 %v310_v58, %v274_v57 }
 0x2ca   :  { %v226_v63 = vmul.f32 %v225_v59, %v224_v60 }
 0x2cc   :  { %v233_v0 = vadd.f32 %v275_v61, %v226_v63 }
 0x2ce   :  { %v234_v2 = vmax.f32 %v233_v0, 0.0 }
 0x2d0   :  { %v239_v3 = vmul.f32 %v238_v1, %v234_v2  ;;  %v246_v8 = vmul.f32 %v245_v7, %v234_v2 }
 0x2d2   :  { %240 = vadd.xlane.f32.xlu1 %v239_v3 }
 0x2d6   :  { %247 = vadd.xlane.f32.xlu1 %v246_v8 }
 0x35f   :  { %v241_v9 = vpop.xlane.xlu1 %240 }
 0x363   :  { %v248_v11 = vpop.xlane.xlu1 %247 }
 0x364   :  { %v250_v12 = vsel %vm249_vm2, %v241_v9, %v248_v11 }
 0x365   :  { %v257_v13 = vadd.f32 %v276_v10, %v250_v12 }
 0x367   :  { %259 = vst.msk [vmem:[%s473_s11] sm:$0xff] %vm258_vm3, %v257_v13 }
 0x368   :  { %264 = vsyncpa [#allocation3], 1 }

</bundles_post_ra>
